<compile_context>
chip_gen: v6e
topology: v6e:2x2x1
jax: 0.10.0
libtpu: 0.0.40
codegen_flags: <defaults>
</compile_context>

<pallas_src>
import functools

import jax
import jax.numpy as jnp
from jax.experimental import pallas as pl
from jax.experimental.pallas import tpu as pltpu

HIDDEN = 128
LANES = 128


def dqn_mlp_kernel(x_ref, w1_ref, b1_ref, w2_ref, b2_ref, w3_ref, b3_ref, o_ref):
    # Layer 1: (tm, n_obs) @ (n_obs, 128) + b1, ReLU.  K is tiny (n_obs=4), so
    # both operands stay f32 — full precision for free.
    h1 = jnp.dot(x_ref[...], w1_ref[...], preferred_element_type=jnp.float32)
    h1 = jnp.maximum(h1 + b1_ref[...], 0.0)

    # Layer 2: (tm, 128) @ (128, 128) + b2, ReLU.  Cast activation to the
    # weight dtype (bf16 on the fast MXU path); accumulate in f32.
    h2 = jnp.dot(h1.astype(w2_ref.dtype), w2_ref[...],
                 preferred_element_type=jnp.float32)
    h2 = jnp.maximum(h2 + b2_ref[...], 0.0)

    # Layer 3: (tm, 128) @ (128, 128) + b3 (no activation).  Weights/bias are
    # zero-padded to 128 output lanes in the wrapper, so this is a full MXU
    # tile and the store below is an unmasked, lane-dense vst.
    out = jnp.dot(h2.astype(w3_ref.dtype), w3_ref[...],
                  preferred_element_type=jnp.float32)
    o_ref[...] = (out + b3_ref[...]).astype(o_ref.dtype)


def _round_up(n, m):
    return ((n + m - 1) // m) * m


@functools.partial(jax.jit, static_argnames=("tm", "use_bf16"))
def dqn_forward(x, params, *, tm=512, use_bf16=True):
    """x: (B, n_observations) float32. Returns (B, n_actions) float32."""
    w1, b1, w2, b2, w3, b3 = params
    B, n_obs = x.shape
    n_actions = w3.shape[1]

    # ---- lane-dense output: pad layer-3 weights/bias to a multiple of 128 ----
    n_pad = _round_up(max(n_actions, 1), LANES)
    w3p = jnp.pad(w3, ((0, 0), (0, n_pad - n_actions)))
    b3p = jnp.pad(b3, ((0, 0), (0, n_pad - n_actions)))

    # bf16 weights for layers 2/3 only; layer-1 operands and all biases stay f32.
    wdt = jnp.bfloat16 if use_bf16 else jnp.float32
    w2c = w2.astype(wdt)
    w3c = w3p.astype(wdt)

    # ---- batch tiling: multiple of 16, single tile when it fits, else >=2
    # parallel tiles (so v7x can split across its two TensorCores). ----
    b16 = _round_up(max(B, 1), 16)
    if b16 <= tm:
        n_tiles = 1
        tm_eff = b16
    else:
        n_tiles = -(-b16 // tm)                       # >= 2
        tm_eff = _round_up(-(-b16 // n_tiles), 16)
    b_pad = tm_eff * n_tiles
    x_p = jnp.pad(x, ((0, b_pad - B), (0, 0))) if b_pad != B else x

    wbytes = 2 if use_bf16 else 4
    flops = 2 * b_pad * (n_obs * HIDDEN + HIDDEN * HIDDEN + HIDDEN * n_pad)
    bytes_accessed = (
        b_pad * n_obs * 4                                    # x (f32)
        + n_obs * HIDDEN * 4                                 # w1 (f32)
        + (HIDDEN * HIDDEN + HIDDEN * n_pad) * wbytes        # w2, w3 (bf16)
        + (HIDDEN + HIDDEN + n_pad) * 4                      # biases (f32)
        + b_pad * n_pad * 4                                   # output (f32)
    )

    # Weights/biases: constant block index -> fetched once, VMEM-resident.
    out = pl.pallas_call(
        dqn_mlp_kernel,
        out_shape=jax.ShapeDtypeStruct((b_pad, n_pad), jnp.float32),
        grid=(n_tiles,),
        in_specs=[
            pl.BlockSpec((tm_eff, n_obs), lambda i: (i, 0)),  # x: tiled over batch
            pl.BlockSpec((n_obs, HIDDEN), lambda i: (0, 0)),  # w1
            pl.BlockSpec((1, HIDDEN), lambda i: (0, 0)),      # b1
            pl.BlockSpec((HIDDEN, HIDDEN), lambda i: (0, 0)), # w2
            pl.BlockSpec((1, HIDDEN), lambda i: (0, 0)),      # b2
            pl.BlockSpec((HIDDEN, n_pad), lambda i: (0, 0)),  # w3 (lane-padded)
            pl.BlockSpec((1, n_pad), lambda i: (0, 0)),       # b3 (lane-padded)
        ],
        out_specs=pl.BlockSpec((tm_eff, n_pad), lambda i: (i, 0)),
        compiler_params=pltpu.CompilerParams(
            dimension_semantics=("parallel",),   # batch tiles are independent
        ),
        cost_estimate=pl.CostEstimate(
            flops=flops, transcendentals=0, bytes_accessed=bytes_accessed
        ),
    )(x_p, w1, b1, w2c, b2, w3c, b3p)

    # Slice off padded batch rows and padded action lanes (padded lanes are
    # exact zeros; padded rows carry garbage Q-values and must not be reduced).
    return out[:B, :n_actions]


def init_dqn_params(key, n_observations, n_actions, hidden=HIDDEN):
    """Deterministic init mimicking PyTorch nn.Linear default U(-1/sqrt(fan_in), ...)."""
    keys = jax.random.split(key, 6)

    def linear(kw, kb, fan_in, fan_out):
        bound = 1.0 / jnp.sqrt(jnp.float32(fan_in))
        # Store weight as (in, out) so the kernel computes x @ W.
        w = jax.random.uniform(kw, (fan_in, fan_out), jnp.float32, -bound, bound)
        b = jax.random.uniform(kb, (1, fan_out), jnp.float32, -bound, bound)
        return w, b

    w1, b1 = linear(keys[0], keys[1], n_observations, hidden)
    w2, b2 = linear(keys[2], keys[3], hidden, hidden)
    w3, b3 = linear(keys[4], keys[5], hidden, n_actions)
    return (w1, b1, w2, b2, w3, b3)


def dqn_reference(x, params, use_bf16=True):
    """Pure-JAX reference mirroring the kernel's dtype path (f32 layer 1,
    bf16 operands / f32 accumulation for layers 2 and 3)."""
    w1, b1, w2, b2, w3, b3 = params
    wdt = jnp.bfloat16 if use_bf16 else jnp.float32
    h = jnp.maximum(jnp.dot(x, w1, preferred_element_type=jnp.float32) + b1, 0.0)
    h = jnp.maximum(
        jnp.dot(h.astype(wdt), w2.astype(wdt),
                preferred_element_type=jnp.float32) + b2, 0.0)
    return jnp.dot(h.astype(wdt), w3.astype(wdt),
                   preferred_element_type=jnp.float32) + b3


if __name__ == "__main__":
    # CartPole-v1: n_observations = 4, n_actions = 2
    n_observations, n_actions = 4, 2

    key = jax.random.PRNGKey(0)
    k_params, k_small, k_large = jax.random.split(key, 3)
    params = init_dqn_params(k_params, n_observations, n_actions)

    # --- acting path: small batch -> single 16-row tile ---------------------
    x_small = jax.random.normal(k_small, (8, n_observations), jnp.float32)
    out_small = jax.block_until_ready(dqn_forward(x_small, params))
    assert out_small.shape == (8, n_actions)
    assert jnp.allclose(out_small, dqn_reference(x_small, params),
                        atol=2e-3, rtol=2e-3)
    assert jnp.allclose(out_small, dqn_reference(x_small, params, use_bf16=False),
                        atol=5e-2, rtol=5e-2)

    # --- replay-buffer path: non-divisible batch -> 2 parallel batch tiles,
    # VMEM-resident weights (constant index maps), lane-padded output. -------
    x_large = jax.random.normal(k_large, (600, n_observations), jnp.float32)
    out_large = jax.block_until_ready(dqn_forward(x_large, params))
    assert out_large.shape == (600, n_actions)
    assert jnp.allclose(out_large, dqn_reference(x_large, params),
                        atol=2e-3, rtol=2e-3)

    print("KERNEL_OK")
</pallas_src>

<mosaic_0001>
module attributes {stable_mosaic.version = 11 : i64} {
  func.func @dqn_mlp_kernel(%arg0: i32, %arg1: memref<16x4xf32, #tpu.memory_space<vmem>>, %arg2: memref<4x128xf32, #tpu.memory_space<vmem>>, %arg3: memref<1x128xf32, #tpu.memory_space<vmem>>, %arg4: memref<128x128xbf16, #tpu.memory_space<vmem>>, %arg5: memref<1x128xf32, #tpu.memory_space<vmem>>, %arg6: memref<128x128xbf16, #tpu.memory_space<vmem>>, %arg7: memref<1x128xf32, #tpu.memory_space<vmem>>, %arg8: memref<16x128xf32, #tpu.memory_space<vmem>>) attributes {dimension_semantics = [#tpu.dimension_semantics<parallel>], iteration_bounds = array<i64: 1>, scalar_prefetch = 0 : i64, scratch_operands = 0 : i64, tpu.core_type = #tpu.core_type<tc>, window_params = [{transform_indices = @transform_0, window_bounds = array<i64: 16, 4>}, {pipeline_mode = #tpu.pipeline_mode<synchronous>, transform_indices = @transform_1, window_bounds = array<i64: 4, 128>}, {pipeline_mode = #tpu.pipeline_mode<synchronous>, transform_indices = @transform_2, window_bounds = array<i64: 1, 128>}, {pipeline_mode = #tpu.pipeline_mode<synchronous>, transform_indices = @transform_3, window_bounds = array<i64: 128, 128>}, {pipeline_mode = #tpu.pipeline_mode<synchronous>, transform_indices = @transform_4, window_bounds = array<i64: 1, 128>}, {pipeline_mode = #tpu.pipeline_mode<synchronous>, transform_indices = @transform_5, window_bounds = array<i64: 128, 128>}, {pipeline_mode = #tpu.pipeline_mode<synchronous>, transform_indices = @transform_6, window_bounds = array<i64: 1, 128>}, {transform_indices = @transform_7, window_bounds = array<i64: 16, 128>}]} {
    %c0 = arith.constant 0 : index
    %c0_0 = arith.constant 0 : index
    %0 = vector.load %arg1[%c0, %c0_0] : memref<16x4xf32, #tpu.memory_space<vmem>>, vector<16x4xf32>
    %c0_1 = arith.constant 0 : index
    %c0_2 = arith.constant 0 : index
    %1 = vector.load %arg2[%c0_1, %c0_2] : memref<4x128xf32, #tpu.memory_space<vmem>>, vector<4x128xf32>
    %cst = arith.constant dense<0.000000e+00> : vector<16x128xf32>
    %2 = tpu.matmul %0, %1, %cst {dimension_numbers = #tpu.dot_dimension_numbers<[1], [0], [0], [1], [0, 0, 1, 1], [], []>} : vector<16x4xf32>, vector<4x128xf32>, vector<16x128xf32> -> vector<16x128xf32>
    %c0_3 = arith.constant 0 : index
    %c0_4 = arith.constant 0 : index
    %3 = vector.load %arg3[%c0_3, %c0_4] : memref<1x128xf32, #tpu.memory_space<vmem>>, vector<1x128xf32>
    %4 = vector.broadcast %3 : vector<1x128xf32> to vector<16x128xf32>
    %5 = arith.addf %2, %4 : vector<16x128xf32>
    %cst_5 = arith.constant 0.000000e+00 : f32
    %6 = vector.broadcast %cst_5 : f32 to vector<16x128xf32>
    %7 = arith.maximumf %5, %6 : vector<16x128xf32>
    %8 = arith.truncf %7 : vector<16x128xf32> to vector<16x128xbf16>
    %c0_6 = arith.constant 0 : index
    %c0_7 = arith.constant 0 : index
    %9 = vector.load %arg4[%c0_6, %c0_7] : memref<128x128xbf16, #tpu.memory_space<vmem>>, vector<128x128xbf16>
    %cst_8 = arith.constant dense<0.000000e+00> : vector<16x128xf32>
    %10 = tpu.matmul %8, %9, %cst_8 {dimension_numbers = #tpu.dot_dimension_numbers<[1], [0], [0], [1], [0, 0, 1, 1], [], []>} : vector<16x128xbf16>, vector<128x128xbf16>, vector<16x128xf32> -> vector<16x128xf32>
    %c0_9 = arith.constant 0 : index
    %c0_10 = arith.constant 0 : index
    %11 = vector.load %arg5[%c0_9, %c0_10] : memref<1x128xf32, #tpu.memory_space<vmem>>, vector<1x128xf32>
    %12 = vector.broadcast %11 : vector<1x128xf32> to vector<16x128xf32>
    %13 = arith.addf %10, %12 : vector<16x128xf32>
    %cst_11 = arith.constant 0.000000e+00 : f32
    %14 = vector.broadcast %cst_11 : f32 to vector<16x128xf32>
    %15 = arith.maximumf %13, %14 : vector<16x128xf32>
    %16 = arith.truncf %15 : vector<16x128xf32> to vector<16x128xbf16>
    %c0_12 = arith.constant 0 : index
    %c0_13 = arith.constant 0 : index
    %17 = vector.load %arg6[%c0_12, %c0_13] : memref<128x128xbf16, #tpu.memory_space<vmem>>, vector<128x128xbf16>
    %cst_14 = arith.constant dense<0.000000e+00> : vector<16x128xf32>
    %18 = tpu.matmul %16, %17, %cst_14 {dimension_numbers = #tpu.dot_dimension_numbers<[1], [0], [0], [1], [0, 0, 1, 1], [], []>} : vector<16x128xbf16>, vector<128x128xbf16>, vector<16x128xf32> -> vector<16x128xf32>
    %c0_15 = arith.constant 0 : index
    %c0_16 = arith.constant 0 : index
    %19 = vector.load %arg7[%c0_15, %c0_16] : memref<1x128xf32, #tpu.memory_space<vmem>>, vector<1x128xf32>
    %20 = vector.broadcast %19 : vector<1x128xf32> to vector<16x128xf32>
    %21 = arith.addf %18, %20 : vector<16x128xf32>
    %c0_17 = arith.constant 0 : index
    %c0_18 = arith.constant 0 : index
    %22 = vector.load %arg8[%c0_17, %c0_18] : memref<16x128xf32, #tpu.memory_space<vmem>>, vector<16x128xf32>
    tpu.vector_store %arg8[%c0_17, %c0_18], %21 {strides = array<i32>} : memref<16x128xf32, #tpu.memory_space<vmem>>, vector<16x128xf32>,
    return
  }
  func.func @transform_0(%arg0: i32) -> (i32, i32) {
    %c0_i32 = arith.constant 0 : i32
    %c0_i32_0 = arith.constant 0 : i32
    return %arg0, %c0_i32 : i32, i32
  }
  func.func @transform_1(%arg0: i32) -> (i32, i32) {
    %c0_i32 = arith.constant 0 : i32
    %c0_i32_0 = arith.constant 0 : i32
    %c0_i32_1 = arith.constant 0 : i32
    return %c0_i32, %c0_i32_0 : i32, i32
  }
  func.func @transform_2(%arg0: i32) -> (i32, i32) {
    %c0_i32 = arith.constant 0 : i32
    %c0_i32_0 = arith.constant 0 : i32
    %c0_i32_1 = arith.constant 0 : i32
    return %c0_i32, %c0_i32_0 : i32, i32
  }
  func.func @transform_3(%arg0: i32) -> (i32, i32) {
    %c0_i32 = arith.constant 0 : i32
    %c0_i32_0 = arith.constant 0 : i32
    %c0_i32_1 = arith.constant 0 : i32
    return %c0_i32, %c0_i32_0 : i32, i32
  }
  func.func @transform_4(%arg0: i32) -> (i32, i32) {
    %c0_i32 = arith.constant 0 : i32
    %c0_i32_0 = arith.constant 0 : i32
    %c0_i32_1 = arith.constant 0 : i32
    return %c0_i32, %c0_i32_0 : i32, i32
  }
  func.func @transform_5(%arg0: i32) -> (i32, i32) {
    %c0_i32 = arith.constant 0 : i32
    %c0_i32_0 = arith.constant 0 : i32
    %c0_i32_1 = arith.constant 0 : i32
    return %c0_i32, %c0_i32_0 : i32, i32
  }
  func.func @transform_6(%arg0: i32) -> (i32, i32) {
    %c0_i32 = arith.constant 0 : i32
    %c0_i32_0 = arith.constant 0 : i32
    %c0_i32_1 = arith.constant 0 : i32
    return %c0_i32, %c0_i32_0 : i32, i32
  }
  func.func @transform_7(%arg0: i32) -> (i32, i32) {
    %c0_i32 = arith.constant 0 : i32
    %c0_i32_0 = arith.constant 0 : i32
    return %arg0, %c0_i32 : i32, i32
  }
}

</mosaic_0001>

<bundles_post_ra>
// kernel: dqn_forward.1
= control target key start
LH: loop header
LB: loop body
LE: loop exit
PB: predicated region body
PF: predicated region fallthrough
CT: control target
= control target key end

     0   :  { %vm44_vm0 = vcmask 1043456   ;;  %vm37_vm1 = vcmask 31744   ;;  %v465_v3 = vmov 0.0   ;;  %vm466_vm2 = vmmov 0   ;;  %s597_s1 = inlined_call_operand.vmem [shape: f32[4,128], index: 1, kind: input, shape index: {}]   ;;  %s598_s0 = inlined_call_operand.vmem [shape: f32[16,4], index: 0, kind: input, shape index: {}]   ;;  %s599_s3 = inlined_call_operand.vmem [shape: bf16[128,128], index: 3, kind: input, shape index: {}]   ;;  %s600_s5 = inlined_call_operand.vmem [shape: bf16[128,128], index: 5, kind: input, shape index: {}]   ;;  %s601_s2 = inlined_call_operand.vmem [shape: f32[1,128], index: 2, kind: input, shape index: {}]   ;;  %s602_s4 = inlined_call_operand.vmem [shape: f32[1,128], index: 4, kind: input, shape index: {}]   ;;  %s603_s6 = inlined_call_operand.vmem [shape: f32[1,128], index: 6, kind: input, shape index: {}]   ;;  %s604_s7 = inlined_call_operand.vmem [shape: f32[16,128], index: 7, kind: output, shape index: {}]  }
   0x1   :  { %v29_v0 = vld [vmem:[%s597_s1] sm:$0xf]  ;;  %v28_v2 = vld [vmem:[%s598_s0 + $0x8] sm:$0xff]  ;;  %407 = vmatprep.subr.bf16.mxu1 %v465_v3  ;;  %v449_v4 = vld [vmem:[%s599_s3 + $0x38] sm:$0xff]   ;;  %423 = vmatprep.mubr.msk.bf16.mxu1 %vm466_vm2, %v465_v3 }
   0x2   :  { %v27_v1 = vld [vmem:[%s598_s0] sm:$0xff]  ;;  %402 = vmatprep.subr.msk.mxu0 %vm44_vm0, %v29_v0  ;;  %408 = vmatpush3.bf16.msra.mxu1 %v449_v4  ;;  %v450_v5 = vld [vmem:[%s599_s3 + $0x30] sm:$0xff]   ;;  %v451_v6 = vld [vmem:[%s599_s3 + $0x28] sm:$0xff]  }
   0x3   :  { %404 = vmatprep.mubr.msk.f32.mxu0 %vm37_vm1, %v27_v1  ;;  %403 = vmatpush3.msk.msra.mxu0 %vm44_vm0, %v29_v0  ;;  %v452_v7 = vld [vmem:[%s599_s3 + $0x20] sm:$0xff]   ;;  %v453_v8 = vld [vmem:[%s599_s3 + $0x18] sm:$0xff]   ;;  %v454_v9 = vld [vmem:[%s599_s3 + $0x10] sm:$0xff]  }
   0x4   :  { %405 = vmatmul.mubr.msk.f32.vlgmr.msra.gmra.mxu0 %vm37_vm1, %v28_v2  ;;  %409 = vmatprep.subr.bf16.mxu1 %v465_v3  ;;  %v455_v10 = vld [vmem:[%s599_s3 + $0x8] sm:$0xff]   ;;  %v456_v11 = vld [vmem:[%s599_s3] sm:$0xff]   ;;  %v457_v12 = vld [vmem:[%s600_s5 + $0x38] sm:$0xff]  }
   0x5   :  { %427 = vmatprep.subr.bf16.mxu0 %v465_v3  ;;  %443 = vmatprep.mubr.msk.bf16.mxu0 %vm466_vm2, %v465_v3  ;;  %v458_v13 = vld [vmem:[%s600_s5 + $0x30] sm:$0xff]   ;;  %v459_v14 = vld [vmem:[%s600_s5 + $0x28] sm:$0xff]   ;;  %v460_v15 = vld [vmem:[%s600_s5 + $0x20] sm:$0xff]  }
   0x6   :  { %410 = vmatpush3.bf16.msra.mxu1 %v450_v5  ;;  %428 = vmatpush3.bf16.msra.mxu0 %v457_v12  ;;  %v461_v16 = vld [vmem:[%s600_s5 + $0x18] sm:$0xff]   ;;  %v359_v17 = vld [vmem:[%s601_s2] ss:$0 sm:$0xff]  ;;  %v462_v25 = vld [vmem:[%s600_s5 + $0x10] sm:$0xff]  }
   0x7   :  { %411 = vmatprep.subr.bf16.mxu1 %v465_v3  ;;  %429 = vmatprep.subr.bf16.mxu0 %v465_v3  ;;  %v463_v26 = vld [vmem:[%s600_s5 + $0x8] sm:$0xff]   ;;  %v464_v27 = vld [vmem:[%s600_s5] sm:$0xff]  }
   0x8   :  { %v363_v28 = vld [vmem:[%s602_s4] ss:$0 sm:$0xff] }
   0x9   :  { %v372_v38 = vld [vmem:[%s603_s6] ss:$0 sm:$0xff] }
   0xa   :  { %412 = vmatpush3.bf16.msra.mxu1 %v451_v6  ;;  %430 = vmatpush3.bf16.msra.mxu0 %v458_v13 }
   0xb   :  { %413 = vmatprep.subr.bf16.mxu1 %v465_v3  ;;  %431 = vmatprep.subr.bf16.mxu0 %v465_v3 }
   0xe   :  { %414 = vmatpush3.bf16.msra.mxu1 %v452_v7  ;;  %432 = vmatpush3.bf16.msra.mxu0 %v459_v14 }
   0xf   :  { %415 = vmatprep.subr.bf16.mxu1 %v465_v3  ;;  %433 = vmatprep.subr.bf16.mxu0 %v465_v3 }
  0x12   :  { %416 = vmatpush3.bf16.msra.mxu1 %v453_v8  ;;  %434 = vmatpush3.bf16.msra.mxu0 %v460_v15 }
  0x13   :  { %417 = vmatprep.subr.bf16.mxu1 %v465_v3  ;;  %435 = vmatprep.subr.bf16.mxu0 %v465_v3 }
  0x16   :  { %418 = vmatpush3.bf16.msra.mxu1 %v454_v9  ;;  %436 = vmatpush3.bf16.msra.mxu0 %v461_v16 }
  0x17   :  { %419 = vmatprep.subr.bf16.mxu1 %v465_v3  ;;  %437 = vmatprep.subr.bf16.mxu0 %v465_v3 }
  0x1a   :  { %420 = vmatpush3.bf16.msra.mxu1 %v455_v10  ;;  %438 = vmatpush3.bf16.msra.mxu0 %v462_v25 }
  0x1b   :  { %421 = vmatprep.subr.bf16.mxu1 %v465_v3  ;;  %439 = vmatprep.subr.bf16.mxu0 %v465_v3 }
  0x1e   :  { %422 = vmatpush3.bf16.msra.mxu1 %v456_v11  ;;  %440 = vmatpush3.bf16.msra.mxu0 %v463_v26 }
  0x1f   :  { %441 = vmatprep.subr.bf16.mxu0 %v465_v3 }
  0x22   :  { %442 = vmatpush3.bf16.msra.mxu0 %v464_v27 }
  0xc4   :  { %v406_v18 = vpop.f32.mrf.mxu0 }
  0xc5   :  { %v120_v19 = vadd.f32 %v406_v18, %v359_v17 }
  0xc6   :  { %v114_v20 = vpop.f32.mrf.mxu0 }
  0xc7   :  { %v115_v21 = vadd.f32 %v359_v17, %v114_v20  ;;  %v124_v22 = vmax.f32 %v120_v19, 0.0 }
  0xc9   :  { %v123_v23 = vmax.f32 %v115_v21, 0.0 }
  0xcb   :  { %v125_v24 = vpack.c.bf16 %v124_v22, %v123_v23 }
  0xcd   :  { %424 = vmatmul.mubr.bf16.vlgmr.msra.gmra.mxu1 %v125_v24 }
 0x18d   :  { %v231_v29 = vpop.f32.mrf.mxu1 }
 0x18e   :  { %v232_v31 = vadd.f32 %v363_v28, %v231_v29 }
 0x18f   :  { %v425_v30 = vpop.f32.mrf.mxu1 }
 0x190   :  { %v238_v35 = vmax.f32 %v232_v31, 0.0 }
 0x191   :  { %v234_v32 = vpop.f32.mrf.mxu1 }
 0x192   :  { %v235_v33 = vadd.f32 %v363_v28, %v234_v32 }
 0x193   :  { %v426_v34 = vpop.f32.mrf.mxu1 }
 0x194   :  { %v239_v36 = vmax.f32 %v235_v33, 0.0 }
 0x196   :  { %v240_v37 = vpack.c.bf16 %v239_v36, %v238_v35 }
 0x198   :  { %444 = vmatmul.mubr.bf16.vlgmr.msra.gmra.mxu0 %v240_v37 }
 0x258   :  { %v346_v39 = vpop.f32.mrf.mxu0 }
 0x259   :  { %v347_v40 = vadd.f32 %v372_v38, %v346_v39 }
 0x25a   :  { %v445_v41 = vpop.f32.mrf.mxu0 }
 0x25b   :  { %353 = vst [vmem:[%s604_s7] sm:$0xff] %v347_v40 }
 0x25c   :  { %v349_v42 = vpop.f32.mrf.mxu0 }
 0x25d   :  { %v350_v43 = vadd.f32 %v372_v38, %v349_v42 }
 0x25e   :  { %v446_v44 = vpop.f32.mrf.mxu0 }
 0x25f   :  { %354 = vst [vmem:[%s604_s7 + $0x8] sm:$0xff] %v350_v43 }

</bundles_post_ra>
